<compile_context>
chip_gen: v7x
topology: tpu7x:2x2x1
jax: 0.10.0
libtpu: 0.0.40
codegen_flags: <defaults>
</compile_context>

<pallas_src>
import functools

import jax
import jax.numpy as jnp
from jax import lax
from jax.experimental import pallas as pl
from jax.experimental.pallas import tpu as pltpu

EPS = 1e-05
MOMENTUM = 0.1  # running-stat update is a buffer side-effect, not the output
IN_CHANNELS = 3
OUT_CHANNELS = 16
KERNEL_SIZE = 3
C_PAD = 8  # pad the input-channel (contraction) axis to a full sublane group


def _fused_kernel(x_hbm, w_ref, p_ref, m_ref, o_ref, x_slab, im2col, sem,
                  *, eps, B, C, H, W, OH, OW, KH, KW):
    """x_hbm: (B, C, H*W) in HBM.  w_ref: (OC, KH*KW*C_PAD).  p_ref: (OC, 3).
    m_ref: (1, B*H*W) valid-column mask.  o_ref: (OC, B*H*W) lane-dense output.
    x_slab: (C_PAD, B*H*W + lane_pad) scratch.  im2col: (KH*KW*C_PAD, B*H*W).
    """
    HW = H * W
    BHW = B * H * W
    cpad = x_slab.shape[0]

    # 1) DMA the B*C contiguous H*W chunks from HBM straight into the
    #    channel-major slab (layout change done by the DMA engine; all
    #    destination lane offsets are multiples of 128 since H*W=256).
    copies = []
    for b in range(B):
        for c in range(C):
            cp = pltpu.make_async_copy(
                x_hbm.at[b, c],
                x_slab.at[c, pl.ds(b * HW, HW)],
                sem.at[b, c])
            cp.start()
            copies.append(cp)

    # 2) Zero only the regions the DMAs do NOT write (pad channels + lane
    #    tail) while the DMAs are in flight; disjoint -> no ordering hazard.
    x_slab[C:, :] = jnp.zeros((cpad - C, x_slab.shape[1]), x_slab.dtype)
    x_slab[:C, BHW:] = jnp.zeros((C, x_slab.shape[1] - BHW), x_slab.dtype)

    for cp in copies:
        cp.wait()

    # 3) In-kernel im2col: stack the KH*KW statically shifted lane windows on
    #    the sublane axis (8-aligned row groups, lane-dense stores).
    for p in range(KH * KW):
        kh, kw = divmod(p, KW)
        s = kh * W + kw
        im2col[p * cpad:(p + 1) * cpad, :] = x_slab[:, s:s + BHW]

    # 4) Single MXU matmul: (OC, KH*KW*C_PAD) @ (KH*KW*C_PAD, BHW), f32 acc.
    params = p_ref[...]                              # (OC, 3)
    bias = params[:, 0:1]
    gamma = params[:, 1:2]
    beta = params[:, 2:3]
    conv = jnp.dot(w_ref[...], im2col[...],
                   preferred_element_type=jnp.float32) + bias   # (OC, BHW)

    # 5) Mish with a single exp: tanh(softplus(x)) = (t^2+2t)/(t^2+2t+2),
    #    t = e^x; exact divide kept for the 1e-4 tolerance, softplus
    #    threshold-20 passthrough matches PyTorch.
    t = jnp.exp(jnp.minimum(conv, 20.0))
    num = t * (t + 2.0)
    y = jnp.where(conv > 20.0, conv, conv * (num / (num + 2.0)))

    # 6) BatchNorm (training=True): single-pass masked batch statistics.
    mask = m_ref[...]                                # (1, BHW): 1.0 on valid
    inv_n = 1.0 / float(B * OH * OW)
    ym = y * mask
    mean = jnp.sum(ym, axis=1, keepdims=True) * inv_n
    var = jnp.sum(ym * y, axis=1, keepdims=True) * inv_n - mean * mean
    scale = gamma * lax.rsqrt(var + eps)             # fused affine
    shift = beta - mean * scale
    o_ref[...] = y * scale + shift                   # invalid cols cropped outside


def prepare_params(conv_weight, conv_bias, bn_weight, bn_bias, B, H, W):
    """One-time parameter prep (off the per-call hot path)."""
    OC, C, KH, KW = conv_weight.shape
    OH, OW = H - KH + 1, W - KW + 1
    BHW = B * H * W

    # (OC, KH*KW*C_PAD) weight matrix matching the in-kernel im2col layout:
    # column index p*C_PAD + c  holds  conv_weight[:, c, kh, kw], p = kh*KW+kw.
    w_t = conv_weight.transpose(0, 2, 3, 1).reshape(OC, KH * KW, C)
    w_col = jnp.concatenate(
        [w_t, jnp.zeros((OC, KH * KW, C_PAD - C), w_t.dtype)],
        axis=-1).reshape(OC, KH * KW * C_PAD)

    # fold conv_bias / gamma / beta into a single tiny VMEM input
    params = jnp.stack([conv_bias, bn_weight, bn_bias], axis=1)   # (OC, 3)

    # valid-column mask (only h < OH and w < OW positions are real output)
    lane = jnp.arange(BHW)
    mask = (((lane // W) % H < OH) & (lane % W < OW)).astype(jnp.float32)
    mask = mask.reshape(1, BHW)
    return w_col, params, mask


def _make_call(B, C, H, W, OC, KH, KW, eps):
    OH, OW = H - KH + 1, W - KW + 1
    BHW = B * H * W
    max_shift = (KH - 1) * W + (KW - 1)
    lane_pad = ((max_shift + 127) // 128) * 128
    K = KH * KW * C_PAD

    kernel = functools.partial(_fused_kernel, eps=eps, B=B, C=C, H=H, W=W,
                               OH=OH, OW=OW, KH=KH, KW=KW)
    return pl.pallas_call(
        kernel,
        out_shape=jax.ShapeDtypeStruct((OC, BHW), jnp.float32),
        in_specs=[
            pl.BlockSpec(memory_space=pl.ANY),                   # x (HBM)
            pl.BlockSpec(memory_space=pltpu.MemorySpace.VMEM),   # w_col
            pl.BlockSpec(memory_space=pltpu.MemorySpace.VMEM),   # params
            pl.BlockSpec(memory_space=pltpu.MemorySpace.VMEM),   # mask
        ],
        out_specs=pl.BlockSpec(memory_space=pltpu.MemorySpace.VMEM),
        scratch_shapes=[
            pltpu.VMEM((C_PAD, BHW + lane_pad), jnp.float32),    # x_slab
            pltpu.VMEM((K, BHW), jnp.float32),                   # im2col
            pltpu.SemaphoreType.DMA((B, C)),
        ],
        cost_estimate=pl.CostEstimate(
            flops=2 * OC * K * BHW,
            transcendentals=OC * BHW,
            bytes_accessed=4 * (B * C * H * W + OC * K + OC * 3
                                + BHW + OC * BHW)),
    )


@functools.partial(jax.jit, static_argnames=("eps",))
def conv_mish_bn(x, w_col, params, mask, eps=EPS):
    """x: [B, C, H, W] float32.  Returns [B, OC, OH, OW]."""
    B, C, H, W = x.shape
    OC = w_col.shape[0]
    KH = KW = KERNEL_SIZE
    OH, OW = H - KH + 1, W - KW + 1

    call = _make_call(B, C, H, W, OC, KH, KW, eps)
    out2d = call(x.reshape(B, C, H * W), w_col, params, mask)   # (OC, B*H*W)

    # crop the valid OHxOW window and return NCHW (tiny, fused under jit)
    out = out2d.reshape(OC, B, H, W)[:, :, :OH, :OW]
    return out.transpose(1, 0, 2, 3)


if __name__ == "__main__":
    key = jax.random.PRNGKey(0)
    k_x, k_w, k_b, k_g, k_beta, k_rm, k_rv = jax.random.split(key, 7)

    B, C, H, W = 2, IN_CHANNELS, 16, 16
    x = jax.random.normal(k_x, (B, C, H, W), dtype=jnp.float32)

    fan_in = C * KERNEL_SIZE * KERNEL_SIZE
    bound = 1.0 / jnp.sqrt(fan_in)
    conv_weight = jax.random.uniform(
        k_w, (OUT_CHANNELS, C, KERNEL_SIZE, KERNEL_SIZE),
        minval=-bound, maxval=bound, dtype=jnp.float32)
    conv_bias = (jax.random.uniform(k_b, (OUT_CHANNELS,),
                                    minval=-bound, maxval=bound, dtype=jnp.float32)
                 + 0.02 * jax.random.normal(k_b, (OUT_CHANNELS,), dtype=jnp.float32))
    bn_weight = jnp.ones((OUT_CHANNELS,), jnp.float32)
    bn_bias = 0.02 * jax.random.normal(k_beta, (OUT_CHANNELS,), dtype=jnp.float32)
    # TODO(synk): running_mean/running_var momentum update is a buffer
    # side-effect, not part of the returned tensor, so it is omitted here.
    bn_running_mean = 0.02 * jax.random.normal(k_rm, (OUT_CHANNELS,), dtype=jnp.float32)
    bn_running_var = 1.0 + jnp.abs(
        0.02 * jax.random.normal(k_rv, (OUT_CHANNELS,), dtype=jnp.float32))

    # One-time parameter prep (off the hot path).
    w_col, params, mask = prepare_params(conv_weight, conv_bias,
                                         bn_weight, bn_bias, B, H, W)

    out = conv_mish_bn(x, w_col, params, mask)
    jax.block_until_ready(out)

    # sanity check against a pure-JAX reference
    conv_ref = lax.conv_general_dilated(
        x, conv_weight, window_strides=(1, 1), padding="VALID",
        dimension_numbers=("NCHW", "OIHW", "NCHW"),
        precision=lax.Precision.HIGHEST) + conv_bias[None, :, None, None]
    sp = jnp.where(conv_ref > 20.0, conv_ref,
                   jnp.log1p(jnp.exp(jnp.minimum(conv_ref, 20.0))))
    y_ref = conv_ref * jnp.tanh(sp)
    mean = jnp.mean(y_ref, axis=(0, 2, 3), keepdims=True)
    var = jnp.mean((y_ref - mean) ** 2, axis=(0, 2, 3), keepdims=True)
    ref = (bn_weight[None, :, None, None] * (y_ref - mean)
           / jnp.sqrt(var + EPS) + bn_bias[None, :, None, None])
    assert jnp.allclose(out, ref, atol=1e-4, rtol=1e-4)

    print("KERNEL_OK")
</pallas_src>

<mosaic_0001>
module attributes {stable_mosaic.version = 11 : i64} {
  func.func @_fused_kernel(%arg0: memref<2x3x256xf32, #tpu.memory_space<any>>, %arg1: memref<16x72xf32, #tpu.memory_space<vmem>>, %arg2: memref<16x3xf32, #tpu.memory_space<vmem>>, %arg3: memref<1x512xf32, #tpu.memory_space<vmem>>, %arg4: memref<16x512xf32, #tpu.memory_space<vmem>>, %arg5: memref<8x640xf32, #tpu.memory_space<vmem>>, %arg6: memref<72x512xf32, #tpu.memory_space<vmem>>, %arg7: memref<2x3x!tpu.dma_semaphore, #tpu.memory_space<semaphore_mem>>) attributes {dimension_semantics = [], scalar_prefetch = 0 : i64, scratch_operands = 3 : i64, tpu.core_type = #tpu.core_type<tc>} {
    %c0_i32 = arith.constant 0 : i32
    %c0_i32_0 = arith.constant 0 : i32
    %c0_i32_1 = arith.constant 0 : i32
    %c0_i32_2 = arith.constant 0 : i32
    %c0_i32_3 = arith.constant 0 : i32
    %c0_i32_4 = arith.constant 0 : i32
    %0 = tpu.memref_slice %arg0[%c0_i32, %c0_i32_0, %c0_i32_4] : memref<2x3x256xf32, #tpu.memory_space<any>> -> memref<1x1x256xf32, #tpu.memory_space<any>>
    %1 = tpu.memref_squeeze %0 : memref<1x1x256xf32, #tpu.memory_space<any>> -> memref<256xf32, #tpu.memory_space<any>>
    %c0_i32_5 = arith.constant 0 : i32
    %2 = tpu.memref_slice %arg5[%c0_i32_1, %c0_i32_5] : memref<8x640xf32, #tpu.memory_space<vmem>> -> memref<1x256xf32, #tpu.memory_space<vmem>>
    %3 = tpu.memref_squeeze %2 : memref<1x256xf32, #tpu.memory_space<vmem>> -> memref<256xf32, #tpu.memory_space<vmem>>
    %4 = tpu.memref_slice %arg7[%c0_i32_2, %c0_i32_3] : memref<2x3x!tpu.dma_semaphore, #tpu.memory_space<semaphore_mem>> -> memref<1x1x!tpu.dma_semaphore, #tpu.memory_space<semaphore_mem>>
    %5 = tpu.memref_squeeze %4 : memref<1x1x!tpu.dma_semaphore, #tpu.memory_space<semaphore_mem>> -> memref<!tpu.dma_semaphore, #tpu.memory_space<semaphore_mem>>
    tpu.enqueue_dma source(%1 : memref<256xf32, #tpu.memory_space<any>>) target(%3 : memref<256xf32, #tpu.memory_space<vmem>>) target_semaphore(%5 : memref<!tpu.dma_semaphore, #tpu.memory_space<semaphore_mem>>)
    %c0_i32_6 = arith.constant 0 : i32
    %c1_i32 = arith.constant 1 : i32
    %c1_i32_7 = arith.constant 1 : i32
    %c0_i32_8 = arith.constant 0 : i32
    %c1_i32_9 = arith.constant 1 : i32
    %c0_i32_10 = arith.constant 0 : i32
    %6 = tpu.memref_slice %arg0[%c0_i32_6, %c1_i32, %c0_i32_10] : memref<2x3x256xf32, #tpu.memory_space<any>> -> memref<1x1x256xf32, #tpu.memory_space<any>>
    %7 = tpu.memref_squeeze %6 : memref<1x1x256xf32, #tpu.memory_space<any>> -> memref<256xf32, #tpu.memory_space<any>>
    %c0_i32_11 = arith.constant 0 : i32
    %8 = tpu.memref_slice %arg5[%c1_i32_7, %c0_i32_11] : memref<8x640xf32, #tpu.memory_space<vmem>> -> memref<1x256xf32, #tpu.memory_space<vmem>>
    %9 = tpu.memref_squeeze %8 : memref<1x256xf32, #tpu.memory_space<vmem>> -> memref<256xf32, #tpu.memory_space<vmem>>
    %10 = tpu.memref_slice %arg7[%c0_i32_8, %c1_i32_9] : memref<2x3x!tpu.dma_semaphore, #tpu.memory_space<semaphore_mem>> -> memref<1x1x!tpu.dma_semaphore, #tpu.memory_space<semaphore_mem>>
    %11 = tpu.memref_squeeze %10 : memref<1x1x!tpu.dma_semaphore, #tpu.memory_space<semaphore_mem>> -> memref<!tpu.dma_semaphore, #tpu.memory_space<semaphore_mem>>
    tpu.enqueue_dma source(%7 : memref<256xf32, #tpu.memory_space<any>>) target(%9 : memref<256xf32, #tpu.memory_space<vmem>>) target_semaphore(%11 : memref<!tpu.dma_semaphore, #tpu.memory_space<semaphore_mem>>)
    %c0_i32_12 = arith.constant 0 : i32
    %c2_i32 = arith.constant 2 : i32
    %c2_i32_13 = arith.constant 2 : i32
    %c0_i32_14 = arith.constant 0 : i32
    %c2_i32_15 = arith.constant 2 : i32
    %c0_i32_16 = arith.constant 0 : i32
    %12 = tpu.memref_slice %arg0[%c0_i32_12, %c2_i32, %c0_i32_16] : memref<2x3x256xf32, #tpu.memory_space<any>> -> memref<1x1x256xf32, #tpu.memory_space<any>>
    %13 = tpu.memref_squeeze %12 : memref<1x1x256xf32, #tpu.memory_space<any>> -> memref<256xf32, #tpu.memory_space<any>>
    %c0_i32_17 = arith.constant 0 : i32
    %14 = tpu.memref_slice %arg5[%c2_i32_13, %c0_i32_17] : memref<8x640xf32, #tpu.memory_space<vmem>> -> memref<1x256xf32, #tpu.memory_space<vmem>>
    %15 = tpu.memref_squeeze %14 : memref<1x256xf32, #tpu.memory_space<vmem>> -> memref<256xf32, #tpu.memory_space<vmem>>
    %16 = tpu.memref_slice %arg7[%c0_i32_14, %c2_i32_15] : memref<2x3x!tpu.dma_semaphore, #tpu.memory_space<semaphore_mem>> -> memref<1x1x!tpu.dma_semaphore, #tpu.memory_space<semaphore_mem>>
    %17 = tpu.memref_squeeze %16 : memref<1x1x!tpu.dma_semaphore, #tpu.memory_space<semaphore_mem>> -> memref<!tpu.dma_semaphore, #tpu.memory_space<semaphore_mem>>
    tpu.enqueue_dma source(%13 : memref<256xf32, #tpu.memory_space<any>>) target(%15 : memref<256xf32, #tpu.memory_space<vmem>>) target_semaphore(%17 : memref<!tpu.dma_semaphore, #tpu.memory_space<semaphore_mem>>)
    %c1_i32_18 = arith.constant 1 : i32
    %c0_i32_19 = arith.constant 0 : i32
    %c0_i32_20 = arith.constant 0 : i32
    %c1_i32_21 = arith.constant 1 : i32
    %c0_i32_22 = arith.constant 0 : i32
    %c0_i32_23 = arith.constant 0 : i32
    %18 = tpu.memref_slice %arg0[%c1_i32_18, %c0_i32_19, %c0_i32_23] : memref<2x3x256xf32, #tpu.memory_space<any>> -> memref<1x1x256xf32, #tpu.memory_space<any>>
    %19 = tpu.memref_squeeze %18 : memref<1x1x256xf32, #tpu.memory_space<any>> -> memref<256xf32, #tpu.memory_space<any>>
    %c256_i32 = arith.constant 256 : i32
    %20 = tpu.memref_slice %arg5[%c0_i32_20, %c256_i32] : memref<8x640xf32, #tpu.memory_space<vmem>> -> memref<1x256xf32, #tpu.memory_space<vmem>>
    %21 = tpu.memref_squeeze %20 : memref<1x256xf32, #tpu.memory_space<vmem>> -> memref<256xf32, #tpu.memory_space<vmem>>
    %22 = tpu.memref_slice %arg7[%c1_i32_21, %c0_i32_22] : memref<2x3x!tpu.dma_semaphore, #tpu.memory_space<semaphore_mem>> -> memref<1x1x!tpu.dma_semaphore, #tpu.memory_space<semaphore_mem>>
    %23 = tpu.memref_squeeze %22 : memref<1x1x!tpu.dma_semaphore, #tpu.memory_space<semaphore_mem>> -> memref<!tpu.dma_semaphore, #tpu.memory_space<semaphore_mem>>
    tpu.enqueue_dma source(%19 : memref<256xf32, #tpu.memory_space<any>>) target(%21 : memref<256xf32, #tpu.memory_space<vmem>>) target_semaphore(%23 : memref<!tpu.dma_semaphore, #tpu.memory_space<semaphore_mem>>)
    %c1_i32_24 = arith.constant 1 : i32
    %c1_i32_25 = arith.constant 1 : i32
    %c1_i32_26 = arith.constant 1 : i32
    %c1_i32_27 = arith.constant 1 : i32
    %c1_i32_28 = arith.constant 1 : i32
    %c0_i32_29 = arith.constant 0 : i32
    %24 = tpu.memref_slice %arg0[%c1_i32_24, %c1_i32_25, %c0_i32_29] : memref<2x3x256xf32, #tpu.memory_space<any>> -> memref<1x1x256xf32, #tpu.memory_space<any>>
    %25 = tpu.memref_squeeze %24 : memref<1x1x256xf32, #tpu.memory_space<any>> -> memref<256xf32, #tpu.memory_space<any>>
    %c256_i32_30 = arith.constant 256 : i32
    %26 = tpu.memref_slice %arg5[%c1_i32_26, %c256_i32_30] : memref<8x640xf32, #tpu.memory_space<vmem>> -> memref<1x256xf32, #tpu.memory_space<vmem>>
    %27 = tpu.memref_squeeze %26 : memref<1x256xf32, #tpu.memory_space<vmem>> -> memref<256xf32, #tpu.memory_space<vmem>>
    %28 = tpu.memref_slice %arg7[%c1_i32_27, %c1_i32_28] : memref<2x3x!tpu.dma_semaphore, #tpu.memory_space<semaphore_mem>> -> memref<1x1x!tpu.dma_semaphore, #tpu.memory_space<semaphore_mem>>
    %29 = tpu.memref_squeeze %28 : memref<1x1x!tpu.dma_semaphore, #tpu.memory_space<semaphore_mem>> -> memref<!tpu.dma_semaphore, #tpu.memory_space<semaphore_mem>>
    tpu.enqueue_dma source(%25 : memref<256xf32, #tpu.memory_space<any>>) target(%27 : memref<256xf32, #tpu.memory_space<vmem>>) target_semaphore(%29 : memref<!tpu.dma_semaphore, #tpu.memory_space<semaphore_mem>>)
    %c1_i32_31 = arith.constant 1 : i32
    %c2_i32_32 = arith.constant 2 : i32
    %c2_i32_33 = arith.constant 2 : i32
    %c1_i32_34 = arith.constant 1 : i32
    %c2_i32_35 = arith.constant 2 : i32
    %c0_i32_36 = arith.constant 0 : i32
    %30 = tpu.memref_slice %arg0[%c1_i32_31, %c2_i32_32, %c0_i32_36] : memref<2x3x256xf32, #tpu.memory_space<any>> -> memref<1x1x256xf32, #tpu.memory_space<any>>
    %31 = tpu.memref_squeeze %30 : memref<1x1x256xf32, #tpu.memory_space<any>> -> memref<256xf32, #tpu.memory_space<any>>
    %c256_i32_37 = arith.constant 256 : i32
    %32 = tpu.memref_slice %arg5[%c2_i32_33, %c256_i32_37] : memref<8x640xf32, #tpu.memory_space<vmem>> -> memref<1x256xf32, #tpu.memory_space<vmem>>
    %33 = tpu.memref_squeeze %32 : memref<1x256xf32, #tpu.memory_space<vmem>> -> memref<256xf32, #tpu.memory_space<vmem>>
    %34 = tpu.memref_slice %arg7[%c1_i32_34, %c2_i32_35] : memref<2x3x!tpu.dma_semaphore, #tpu.memory_space<semaphore_mem>> -> memref<1x1x!tpu.dma_semaphore, #tpu.memory_space<semaphore_mem>>
    %35 = tpu.memref_squeeze %34 : memref<1x1x!tpu.dma_semaphore, #tpu.memory_space<semaphore_mem>> -> memref<!tpu.dma_semaphore, #tpu.memory_space<semaphore_mem>>
    tpu.enqueue_dma source(%31 : memref<256xf32, #tpu.memory_space<any>>) target(%33 : memref<256xf32, #tpu.memory_space<vmem>>) target_semaphore(%35 : memref<!tpu.dma_semaphore, #tpu.memory_space<semaphore_mem>>)
    %cst = arith.constant 0.000000e+00 : f32
    %36 = vector.broadcast %cst : f32 to vector<5x640xf32>
    %c3 = arith.constant 3 : index
    %c0 = arith.constant 0 : index
    %37 = vector.load %arg5[%c3, %c0] : memref<8x640xf32, #tpu.memory_space<vmem>>, vector<5x640xf32>
    tpu.vector_store %arg5[%c3, %c0], %36 {strides = array<i32>} : memref<8x640xf32, #tpu.memory_space<vmem>>, vector<5x640xf32>,
    %cst_38 = arith.constant 0.000000e+00 : f32
    %38 = vector.broadcast %cst_38 : f32 to vector<3x128xf32>
    %c0_39 = arith.constant 0 : index
    %c512 = arith.constant 512 : index
    %39 = vector.load %arg5[%c0_39, %c512] : memref<8x640xf32, #tpu.memory_space<vmem>>, vector<3x128xf32>
    tpu.vector_store %arg5[%c0_39, %c512], %38 {strides = array<i32>} : memref<8x640xf32, #tpu.memory_space<vmem>>, vector<3x128xf32>,
    %c0_i32_40 = arith.constant 0 : i32
    %c0_i32_41 = arith.constant 0 : i32
    %c0_i32_42 = arith.constant 0 : i32
    %c0_i32_43 = arith.constant 0 : i32
    %c0_i32_44 = arith.constant 0 : i32
    %c0_i32_45 = arith.constant 0 : i32
    %40 = tpu.memref_slice %arg0[%c0_i32_40, %c0_i32_41, %c0_i32_45] : memref<2x3x256xf32, #tpu.memory_space<any>> -> memref<1x1x256xf32, #tpu.memory_space<any>>
    %41 = tpu.memref_squeeze %40 : memref<1x1x256xf32, #tpu.memory_space<any>> -> memref<256xf32, #tpu.memory_space<any>>
    %c0_i32_46 = arith.constant 0 : i32
    %42 = tpu.memref_slice %arg5[%c0_i32_42, %c0_i32_46] : memref<8x640xf32, #tpu.memory_space<vmem>> -> memref<1x256xf32, #tpu.memory_space<vmem>>
    %43 = tpu.memref_squeeze %42 : memref<1x256xf32, #tpu.memory_space<vmem>> -> memref<256xf32, #tpu.memory_space<vmem>>
    %44 = tpu.memref_slice %arg7[%c0_i32_43, %c0_i32_44] : memref<2x3x!tpu.dma_semaphore, #tpu.memory_space<semaphore_mem>> -> memref<1x1x!tpu.dma_semaphore, #tpu.memory_space<semaphore_mem>>
    %45 = tpu.memref_squeeze %44 : memref<1x1x!tpu.dma_semaphore, #tpu.memory_space<semaphore_mem>> -> memref<!tpu.dma_semaphore, #tpu.memory_space<semaphore_mem>>
    tpu.wait_dma2 semaphore(%45 : memref<!tpu.dma_semaphore, #tpu.memory_space<semaphore_mem>>) src(%41 : memref<256xf32, #tpu.memory_space<any>>) dst(%43 : memref<256xf32, #tpu.memory_space<vmem>>)
    %c0_i32_47 = arith.constant 0 : i32
    %c1_i32_48 = arith.constant 1 : i32
    %c1_i32_49 = arith.constant 1 : i32
    %c0_i32_50 = arith.constant 0 : i32
    %c1_i32_51 = arith.constant 1 : i32
    %c0_i32_52 = arith.constant 0 : i32
    %46 = tpu.memref_slice %arg0[%c0_i32_47, %c1_i32_48, %c0_i32_52] : memref<2x3x256xf32, #tpu.memory_space<any>> -> memref<1x1x256xf32, #tpu.memory_space<any>>
    %47 = tpu.memref_squeeze %46 : memref<1x1x256xf32, #tpu.memory_space<any>> -> memref<256xf32, #tpu.memory_space<any>>
    %c0_i32_53 = arith.constant 0 : i32
    %48 = tpu.memref_slice %arg5[%c1_i32_49, %c0_i32_53] : memref<8x640xf32, #tpu.memory_space<vmem>> -> memref<1x256xf32, #tpu.memory_space<vmem>>
    %49 = tpu.memref_squeeze %48 : memref<1x256xf32, #tpu.memory_space<vmem>> -> memref<256xf32, #tpu.memory_space<vmem>>
    %50 = tpu.memref_slice %arg7[%c0_i32_50, %c1_i32_51] : memref<2x3x!tpu.dma_semaphore, #tpu.memory_space<semaphore_mem>> -> memref<1x1x!tpu.dma_semaphore, #tpu.memory_space<semaphore_mem>>
    %51 = tpu.memref_squeeze %50 : memref<1x1x!tpu.dma_semaphore, #tpu.memory_space<semaphore_mem>> -> memref<!tpu.dma_semaphore, #tpu.memory_space<semaphore_mem>>
    tpu.wait_dma2 semaphore(%51 : memref<!tpu.dma_semaphore, #tpu.memory_space<semaphore_mem>>) src(%47 : memref<256xf32, #tpu.memory_space<any>>) dst(%49 : memref<256xf32, #tpu.memory_space<vmem>>)
    %c0_i32_54 = arith.constant 0 : i32
    %c2_i32_55 = arith.constant 2 : i32
    %c2_i32_56 = arith.constant 2 : i32
    %c0_i32_57 = arith.constant 0 : i32
    %c2_i32_58 = arith.constant 2 : i32
    %c0_i32_59 = arith.constant 0 : i32
    %52 = tpu.memref_slice %arg0[%c0_i32_54, %c2_i32_55, %c0_i32_59] : memref<2x3x256xf32, #tpu.memory_space<any>> -> memref<1x1x256xf32, #tpu.memory_space<any>>
    %53 = tpu.memref_squeeze %52 : memref<1x1x256xf32, #tpu.memory_space<any>> -> memref<256xf32, #tpu.memory_space<any>>
    %c0_i32_60 = arith.constant 0 : i32
    %54 = tpu.memref_slice %arg5[%c2_i32_56, %c0_i32_60] : memref<8x640xf32, #tpu.memory_space<vmem>> -> memref<1x256xf32, #tpu.memory_space<vmem>>
    %55 = tpu.memref_squeeze %54 : memref<1x256xf32, #tpu.memory_space<vmem>> -> memref<256xf32, #tpu.memory_space<vmem>>
    %56 = tpu.memref_slice %arg7[%c0_i32_57, %c2_i32_58] : memref<2x3x!tpu.dma_semaphore, #tpu.memory_space<semaphore_mem>> -> memref<1x1x!tpu.dma_semaphore, #tpu.memory_space<semaphore_mem>>
    %57 = tpu.memref_squeeze %56 : memref<1x1x!tpu.dma_semaphore, #tpu.memory_space<semaphore_mem>> -> memref<!tpu.dma_semaphore, #tpu.memory_space<semaphore_mem>>
    tpu.wait_dma2 semaphore(%57 : memref<!tpu.dma_semaphore, #tpu.memory_space<semaphore_mem>>) src(%53 : memref<256xf32, #tpu.memory_space<any>>) dst(%55 : memref<256xf32, #tpu.memory_space<vmem>>)
    %c1_i32_61 = arith.constant 1 : i32
    %c0_i32_62 = arith.constant 0 : i32
    %c0_i32_63 = arith.constant 0 : i32
    %c1_i32_64 = arith.constant 1 : i32
    %c0_i32_65 = arith.constant 0 : i32
    %c0_i32_66 = arith.constant 0 : i32
    %58 = tpu.memref_slice %arg0[%c1_i32_61, %c0_i32_62, %c0_i32_66] : memref<2x3x256xf32, #tpu.memory_space<any>> -> memref<1x1x256xf32, #tpu.memory_space<any>>
    %59 = tpu.memref_squeeze %58 : memref<1x1x256xf32, #tpu.memory_space<any>> -> memref<256xf32, #tpu.memory_space<any>>
    %c256_i32_67 = arith.constant 256 : i32
    %60 = tpu.memref_slice %arg5[%c0_i32_63, %c256_i32_67] : memref<8x640xf32, #tpu.memory_space<vmem>> -> memref<1x256xf32, #tpu.memory_space<vmem>>
    %61 = tpu.memref_squeeze %60 : memref<1x256xf32, #tpu.memory_space<vmem>> -> memref<256xf32, #tpu.memory_space<vmem>>
    %62 = tpu.memref_slice %arg7[%c1_i32_64, %c0_i32_65] : memref<2x3x!tpu.dma_semaphore, #tpu.memory_space<semaphore_mem>> -> memref<1x1x!tpu.dma_semaphore, #tpu.memory_space<semaphore_mem>>
    %63 = tpu.memref_squeeze %62 : memref<1x1x!tpu.dma_semaphore, #tpu.memory_space<semaphore_mem>> -> memref<!tpu.dma_semaphore, #tpu.memory_space<semaphore_mem>>
    tpu.wait_dma2 semaphore(%63 : memref<!tpu.dma_semaphore, #tpu.memory_space<semaphore_mem>>) src(%59 : memref<256xf32, #tpu.memory_space<any>>) dst(%61 : memref<256xf32, #tpu.memory_space<vmem>>)
    %c1_i32_68 = arith.constant 1 : i32
    %c1_i32_69 = arith.constant 1 : i32
    %c1_i32_70 = arith.constant 1 : i32
    %c1_i32_71 = arith.constant 1 : i32
    %c1_i32_72 = arith.constant 1 : i32
    %c0_i32_73 = arith.constant 0 : i32
    %64 = tpu.memref_slice %arg0[%c1_i32_68, %c1_i32_69, %c0_i32_73] : memref<2x3x256xf32, #tpu.memory_space<any>> -> memref<1x1x256xf32, #tpu.memory_space<any>>
    %65 = tpu.memref_squeeze %64 : memref<1x1x256xf32, #tpu.memory_space<any>> -> memref<256xf32, #tpu.memory_space<any>>
    %c256_i32_74 = arith.constant 256 : i32
    %66 = tpu.memref_slice %arg5[%c1_i32_70, %c256_i32_74] : memref<8x640xf32, #tpu.memory_space<vmem>> -> memref<1x256xf32, #tpu.memory_space<vmem>>
    %67 = tpu.memref_squeeze %66 : memref<1x256xf32, #tpu.memory_space<vmem>> -> memref<256xf32, #tpu.memory_space<vmem>>
    %68 = tpu.memref_slice %arg7[%c1_i32_71, %c1_i32_72] : memref<2x3x!tpu.dma_semaphore, #tpu.memory_space<semaphore_mem>> -> memref<1x1x!tpu.dma_semaphore, #tpu.memory_space<semaphore_mem>>
    %69 = tpu.memref_squeeze %68 : memref<1x1x!tpu.dma_semaphore, #tpu.memory_space<semaphore_mem>> -> memref<!tpu.dma_semaphore, #tpu.memory_space<semaphore_mem>>
    tpu.wait_dma2 semaphore(%69 : memref<!tpu.dma_semaphore, #tpu.memory_space<semaphore_mem>>) src(%65 : memref<256xf32, #tpu.memory_space<any>>) dst(%67 : memref<256xf32, #tpu.memory_space<vmem>>)
    %c1_i32_75 = arith.constant 1 : i32
    %c2_i32_76 = arith.constant 2 : i32
    %c2_i32_77 = arith.constant 2 : i32
    %c1_i32_78 = arith.constant 1 : i32
    %c2_i32_79 = arith.constant 2 : i32
    %c0_i32_80 = arith.constant 0 : i32
    %70 = tpu.memref_slice %arg0[%c1_i32_75, %c2_i32_76, %c0_i32_80] : memref<2x3x256xf32, #tpu.memory_space<any>> -> memref<1x1x256xf32, #tpu.memory_space<any>>
    %71 = tpu.memref_squeeze %70 : memref<1x1x256xf32, #tpu.memory_space<any>> -> memref<256xf32, #tpu.memory_space<any>>
    %c256_i32_81 = arith.constant 256 : i32
    %72 = tpu.memref_slice %arg5[%c2_i32_77, %c256_i32_81] : memref<8x640xf32, #tpu.memory_space<vmem>> -> memref<1x256xf32, #tpu.memory_space<vmem>>
    %73 = tpu.memref_squeeze %72 : memref<1x256xf32, #tpu.memory_space<vmem>> -> memref<256xf32, #tpu.memory_space<vmem>>
    %74 = tpu.memref_slice %arg7[%c1_i32_78, %c2_i32_79] : memref<2x3x!tpu.dma_semaphore, #tpu.memory_space<semaphore_mem>> -> memref<1x1x!tpu.dma_semaphore, #tpu.memory_space<semaphore_mem>>
    %75 = tpu.memref_squeeze %74 : memref<1x1x!tpu.dma_semaphore, #tpu.memory_space<semaphore_mem>> -> memref<!tpu.dma_semaphore, #tpu.memory_space<semaphore_mem>>
    tpu.wait_dma2 semaphore(%75 : memref<!tpu.dma_semaphore, #tpu.memory_space<semaphore_mem>>) src(%71 : memref<256xf32, #tpu.memory_space<any>>) dst(%73 : memref<256xf32, #tpu.memory_space<vmem>>)
    %c0_82 = arith.constant 0 : index
    %c0_83 = arith.constant 0 : index
    %76 = vector.load %arg5[%c0_82, %c0_83] : memref<8x640xf32, #tpu.memory_space<vmem>>, vector<8x512xf32>
    %c0_84 = arith.constant 0 : index
    %c0_85 = arith.constant 0 : index
    %77 = vector.load %arg6[%c0_84, %c0_85] : memref<72x512xf32, #tpu.memory_space<vmem>>, vector<8x512xf32>
    tpu.vector_store %arg6[%c0_84, %c0_85], %76 {strides = array<i32>} : memref<72x512xf32, #tpu.memory_space<vmem>>, vector<8x512xf32>,
    %c0_86 = arith.constant 0 : index
    %c1 = arith.constant 1 : index
    %78 = vector.load %arg5[%c0_86, %c1] : memref<8x640xf32, #tpu.memory_space<vmem>>, vector<8x512xf32>
    %c8 = arith.constant 8 : index
    %c0_87 = arith.constant 0 : index
    %79 = vector.load %arg6[%c8, %c0_87] : memref<72x512xf32, #tpu.memory_space<vmem>>, vector<8x512xf32>
    tpu.vector_store %arg6[%c8, %c0_87], %78 {strides = array<i32>} : memref<72x512xf32, #tpu.memory_space<vmem>>, vector<8x512xf32>,
    %c0_88 = arith.constant 0 : index
    %c2 = arith.constant 2 : index
    %80 = vector.load %arg5[%c0_88, %c2] : memref<8x640xf32, #tpu.memory_space<vmem>>, vector<8x512xf32>
    %c16 = arith.constant 16 : index
    %c0_89 = arith.constant 0 : index
    %81 = vector.load %arg6[%c16, %c0_89] : memref<72x512xf32, #tpu.memory_space<vmem>>, vector<8x512xf32>
    tpu.vector_store %arg6[%c16, %c0_89], %80 {strides = array<i32>} : memref<72x512xf32, #tpu.memory_space<vmem>>, vector<8x512xf32>,
    %c0_90 = arith.constant 0 : index
    %c16_91 = arith.constant 16 : index
    %82 = vector.load %arg5[%c0_90, %c16_91] : memref<8x640xf32, #tpu.memory_space<vmem>>, vector<8x512xf32>
    %c24 = arith.constant 24 : index
    %c0_92 = arith.constant 0 : index
    %83 = vector.load %arg6[%c24, %c0_92] : memref<72x512xf32, #tpu.memory_space<vmem>>, vector<8x512xf32>
    tpu.vector_store %arg6[%c24, %c0_92], %82 {strides = array<i32>} : memref<72x512xf32, #tpu.memory_space<vmem>>, vector<8x512xf32>,
    %c0_93 = arith.constant 0 : index
    %c17 = arith.constant 17 : index
    %84 = vector.load %arg5[%c0_93, %c17] : memref<8x640xf32, #tpu.memory_space<vmem>>, vector<8x512xf32>
    %c32 = arith.constant 32 : index
    %c0_94 = arith.constant 0 : index
    %85 = vector.load %arg6[%c32, %c0_94] : memref<72x512xf32, #tpu.memory_space<vmem>>, vector<8x512xf32>
    tpu.vector_store %arg6[%c32, %c0_94], %84 {strides = array<i32>} : memref<72x512xf32, #tpu.memory_space<vmem>>, vector<8x512xf32>,
    %c0_95 = arith.constant 0 : index
    %c18 = arith.constant 18 : index
    %86 = vector.load %arg5[%c0_95, %c18] : memref<8x640xf32, #tpu.memory_space<vmem>>, vector<8x512xf32>
    %c40 = arith.constant 40 : index
    %c0_96 = arith.constant 0 : index
    %87 = vector.load %arg6[%c40, %c0_96] : memref<72x512xf32, #tpu.memory_space<vmem>>, vector<8x512xf32>
    tpu.vector_store %arg6[%c40, %c0_96], %86 {strides = array<i32>} : memref<72x512xf32, #tpu.memory_space<vmem>>, vector<8x512xf32>,
    %c0_97 = arith.constant 0 : index
    %c32_98 = arith.constant 32 : index
    %88 = vector.load %arg5[%c0_97, %c32_98] : memref<8x640xf32, #tpu.memory_space<vmem>>, vector<8x512xf32>
    %c48 = arith.constant 48 : index
    %c0_99 = arith.constant 0 : index
    %89 = vector.load %arg6[%c48, %c0_99] : memref<72x512xf32, #tpu.memory_space<vmem>>, vector<8x512xf32>
    tpu.vector_store %arg6[%c48, %c0_99], %88 {strides = array<i32>} : memref<72x512xf32, #tpu.memory_space<vmem>>, vector<8x512xf32>,
    %c0_100 = arith.constant 0 : index
    %c33 = arith.constant 33 : index
    %90 = vector.load %arg5[%c0_100, %c33] : memref<8x640xf32, #tpu.memory_space<vmem>>, vector<8x512xf32>
    %c56 = arith.constant 56 : index
    %c0_101 = arith.constant 0 : index
    %91 = vector.load %arg6[%c56, %c0_101] : memref<72x512xf32, #tpu.memory_space<vmem>>, vector<8x512xf32>
    tpu.vector_store %arg6[%c56, %c0_101], %90 {strides = array<i32>} : memref<72x512xf32, #tpu.memory_space<vmem>>, vector<8x512xf32>,
    %c0_102 = arith.constant 0 : index
    %c34 = arith.constant 34 : index
    %92 = vector.load %arg5[%c0_102, %c34] : memref<8x640xf32, #tpu.memory_space<vmem>>, vector<8x512xf32>
    %c64 = arith.constant 64 : index
    %c0_103 = arith.constant 0 : index
    %93 = vector.load %arg6[%c64, %c0_103] : memref<72x512xf32, #tpu.memory_space<vmem>>, vector<8x512xf32>
    tpu.vector_store %arg6[%c64, %c0_103], %92 {strides = array<i32>} : memref<72x512xf32, #tpu.memory_space<vmem>>, vector<8x512xf32>,
    %c0_104 = arith.constant 0 : index
    %c0_105 = arith.constant 0 : index
    %94 = vector.load %arg2[%c0_104, %c0_105] : memref<16x3xf32, #tpu.memory_space<vmem>>, vector<16x3xf32>
    %95 = vector.extract_strided_slice %94 {offsets = [0, 0], sizes = [16, 1], strides = [1, 1]} : vector<16x3xf32> to vector<16x1xf32>
    %96 = vector.extract_strided_slice %94 {offsets = [0, 1], sizes = [16, 1], strides = [1, 1]} : vector<16x3xf32> to vector<16x1xf32>
    %97 = vector.extract_strided_slice %94 {offsets = [0, 2], sizes = [16, 1], strides = [1, 1]} : vector<16x3xf32> to vector<16x1xf32>
    %c0_106 = arith.constant 0 : index
    %c0_107 = arith.constant 0 : index
    %98 = vector.load %arg1[%c0_106, %c0_107] : memref<16x72xf32, #tpu.memory_space<vmem>>, vector<16x72xf32>
    %c0_108 = arith.constant 0 : index
    %c0_109 = arith.constant 0 : index
    %99 = vector.load %arg6[%c0_108, %c0_109] : memref<72x512xf32, #tpu.memory_space<vmem>>, vector<72x512xf32>
    %cst_110 = arith.constant dense<0.000000e+00> : vector<16x512xf32>
    %100 = tpu.matmul %98, %99, %cst_110 {dimension_numbers = #tpu.dot_dimension_numbers<[1], [0], [0], [1], [0, 0, 1, 1], [], []>} : vector<16x72xf32>, vector<72x512xf32>, vector<16x512xf32> -> vector<16x512xf32>
    %101 = vector.broadcast %95 : vector<16x1xf32> to vector<16x512xf32>
    %102 = arith.addf %100, %101 : vector<16x512xf32>
    %cst_111 = arith.constant 2.000000e+01 : f32
    %103 = vector.broadcast %cst_111 : f32 to vector<16x512xf32>
    %104 = arith.minimumf %102, %103 : vector<16x512xf32>
    %105 = math.exp %104 : vector<16x512xf32>
    %cst_112 = arith.constant 2.000000e+00 : f32
    %106 = vector.broadcast %cst_112 : f32 to vector<16x512xf32>
    %107 = arith.addf %105, %106 : vector<16x512xf32>
    %108 = arith.mulf %105, %107 : vector<16x512xf32>
    %cst_113 = arith.constant 2.000000e+01 : f32
    %109 = vector.broadcast %cst_113 : f32 to vector<16x512xf32>
    %110 = arith.cmpf ogt, %102, %109 : vector<16x512xf32>
    %cst_114 = arith.constant 2.000000e+00 : f32
    %111 = vector.broadcast %cst_114 : f32 to vector<16x512xf32>
    %112 = arith.addf %108, %111 : vector<16x512xf32>
    %113 = arith.divf %108, %112 : vector<16x512xf32>
    %114 = arith.mulf %102, %113 : vector<16x512xf32>
    %115 = arith.select %110, %102, %114 : vector<16x512xi1>, vector<16x512xf32>
    %c0_115 = arith.constant 0 : index
    %c0_116 = arith.constant 0 : index
    %116 = vector.load %arg3[%c0_115, %c0_116] : memref<1x512xf32, #tpu.memory_space<vmem>>, vector<1x512xf32>
    %117 = vector.broadcast %116 : vector<1x512xf32> to vector<16x512xf32>
    %118 = arith.mulf %115, %117 : vector<16x512xf32>
    %cst_117 = arith.constant dense<0.000000e+00> : vector<16xf32>
    %119 = vector.multi_reduction <add>, %118, %cst_117 [1] : vector<16x512xf32> to vector<16xf32>
    %120 = vector.shape_cast %119 : vector<16xf32> to vector<16x1xf32>
    %cst_118 = arith.constant 0.00255102036 : f32
    %121 = vector.broadcast %cst_118 : f32 to vector<16x1xf32>
    %122 = arith.mulf %120, %121 : vector<16x1xf32>
    %123 = arith.mulf %118, %115 : vector<16x512xf32>
    %cst_119 = arith.constant dense<0.000000e+00> : vector<16xf32>
    %124 = vector.multi_reduction <add>, %123, %cst_119 [1] : vector<16x512xf32> to vector<16xf32>
    %125 = vector.shape_cast %124 : vector<16xf32> to vector<16x1xf32>
    %cst_120 = arith.constant 0.00255102036 : f32
    %126 = vector.broadcast %cst_120 : f32 to vector<16x1xf32>
    %127 = arith.mulf %125, %126 : vector<16x1xf32>
    %128 = arith.mulf %122, %122 : vector<16x1xf32>
    %129 = arith.subf %127, %128 : vector<16x1xf32>
    %cst_121 = arith.constant 9.99999974E-6 : f32
    %130 = vector.broadcast %cst_121 : f32 to vector<16x1xf32>
    %131 = arith.addf %129, %130 : vector<16x1xf32>
    %132 = math.rsqrt %131 : vector<16x1xf32>
    %133 = arith.mulf %96, %132 : vector<16x1xf32>
    %134 = arith.mulf %122, %133 : vector<16x1xf32>
    %135 = arith.subf %97, %134 : vector<16x1xf32>
    %136 = vector.broadcast %133 : vector<16x1xf32> to vector<16x512xf32>
    %137 = arith.mulf %115, %136 : vector<16x512xf32>
    %138 = vector.broadcast %135 : vector<16x1xf32> to vector<16x512xf32>
    %139 = arith.addf %137, %138 : vector<16x512xf32>
    %c0_122 = arith.constant 0 : index
    %c0_123 = arith.constant 0 : index
    %140 = vector.load %arg4[%c0_122, %c0_123] : memref<16x512xf32, #tpu.memory_space<vmem>>, vector<16x512xf32>
    tpu.vector_store %arg4[%c0_122, %c0_123], %139 {strides = array<i32>} : memref<16x512xf32, #tpu.memory_space<vmem>>, vector<16x512xf32>,
    return
  }
}

</mosaic_0001>

<bundles_post_ra>
// kernel: conv_mish_bn.1
= control target key start
LH: loop header
LB: loop body
LE: loop exit
PB: predicated region body
PF: predicated region fallthrough
CT: control target
= control target key end

     0   :  { %s1629_s0 = inlined_call_operand.vmem [shape: f32[2,3,256], index: 0, kind: input, shape index: {}]   ;;  %s1630_s1 = inlined_call_operand.vmem [shape: f32[16,72], index: 1, kind: input, shape index: {}]   ;;  %s1631_s2 = inlined_call_operand.vmem [shape: f32[16,3], index: 2, kind: input, shape index: {}]   ;;  %s1632_s3 = inlined_call_operand.vmem [shape: f32[1,512], index: 3, kind: input, shape index: {}]   ;;  %s1633_s4 = inlined_call_operand.vmem [shape: f32[16,512], index: 4, kind: output, shape index: {}]  }
   0x1   :  { %v32_v0 = vld [vmem:[%s1629_s0] sm:$0x1]  ;;  %v34_v1 = vld [vmem:[%s1629_s0 + $0x4] sm:$0x1] }
   0x2   :  { %33 = vst [vmem:[#allocation2] sm:$0x1] %v32_v0  ;;  %35 = vst [vmem:[#allocation2 + $0x8] sm:$0x1] %v34_v1 }
   0x3   :  { %62 = vsyncadd [#allocation4], 32  ;;  %v1152_v2 = vld [vmem:[%s1629_s0 + $0x1] sm:$0x1]  ;;  %v1153_v3 = vld [vmem:[%s1629_s0 + $0x5] sm:$0x1] }
   0x4   :  { %84 = vst [vmem:[#allocation2 + $0x1] sm:$0x1] %v1152_v2  ;;  %86 = vst [vmem:[#allocation2 + $0x9] sm:$0x1] %v1153_v3 }
   0x5   :  { %113 = vsyncadd [#allocation4 + $0x1], 32  ;;  %v1156_v4 = vld [vmem:[%s1629_s0 + $0x2] sm:$0x1]  ;;  %v1157_v5 = vld [vmem:[%s1629_s0 + $0x6] sm:$0x1] }
   0x6   :  { %135 = vst [vmem:[#allocation2 + $0x2] sm:$0x1] %v1156_v4  ;;  %137 = vst [vmem:[#allocation2 + $0xa] sm:$0x1] %v1157_v5 }
   0x7   :  { %164 = vsyncadd [#allocation4 + $0x2], 32  ;;  %v1160_v6 = vld [vmem:[%s1629_s0 + $0x8] sm:$0x1]  ;;  %v1161_v7 = vld [vmem:[%s1629_s0 + $0xc] sm:$0x1] }
   0x8   :  { %186 = vst [vmem:[#allocation2 + $0x10] sm:$0x1] %v1160_v6  ;;  %188 = vst [vmem:[#allocation2 + $0x18] sm:$0x1] %v1161_v7 }
   0x9   :  { %215 = vsyncadd [#allocation4 + $0x3], 32  ;;  %v1164_v8 = vld [vmem:[%s1629_s0 + $0x9] sm:$0x1]  ;;  %v1165_v9 = vld [vmem:[%s1629_s0 + $0xd] sm:$0x1] }
   0xa   :  { %237 = vst [vmem:[#allocation2 + $0x11] sm:$0x1] %v1164_v8  ;;  %239 = vst [vmem:[#allocation2 + $0x19] sm:$0x1] %v1165_v9 }
   0xb   :  { %266 = vsyncadd [#allocation4 + $0x4], 32  ;;  %v1168_v10 = vld [vmem:[%s1629_s0 + $0xa] sm:$0x1]  ;;  %v1169_v11 = vld [vmem:[%s1629_s0 + $0xe] sm:$0x1] }
   0xc   :  { %288 = vst [vmem:[#allocation2 + $0x12] sm:$0x1] %v1168_v10  ;;  %290 = vst [vmem:[#allocation2 + $0x1a] sm:$0x1] %v1169_v11 }
   0xd   :  { %317 = vsyncadd [#allocation4 + $0x5], 32  ;;  %v1349_v12 = vmov 0.0  }
   0xe   :  { %318 = vst [vmem:[#allocation2] sm:$0xf8] %v1349_v12  ;;  %319 = vst [vmem:[#allocation2 + $0x8] sm:$0xf8] %v1349_v12 }
   0xf   :  { %320 = vst [vmem:[#allocation2 + $0x10] sm:$0xf8] %v1349_v12  ;;  %321 = vst [vmem:[#allocation2 + $0x18] sm:$0xf8] %v1349_v12 }
  0x10   :  { %322 = vst [vmem:[#allocation2 + $0x20] sm:$0xf8] %v1349_v12  ;;  %323 = vst [vmem:[#allocation2 + $0x20] sm:$0x7] %v1349_v12 }
  0x11   :  { %1337 = dma.done.wait [#allocation4], 32 }
  0x12   :  { %1338 = vsyncadd [#allocation4], 4294967264 }
  0x13   :  { %1339 = dma.done.wait [#allocation4 + $0x1], 32 }
  0x14   :  { %1340 = vsyncadd [#allocation4 + $0x1], 4294967264 }
  0x15   :  { %1341 = dma.done.wait [#allocation4 + $0x2], 32 }
  0x16   :  { %1342 = vsyncadd [#allocation4 + $0x2], 4294967264 }
  0x17   :  { %1343 = dma.done.wait [#allocation4 + $0x3], 32 }
  0x18   :  { %1344 = vsyncadd [#allocation4 + $0x3], 4294967264 }
  0x19   :  { %1345 = dma.done.wait [#allocation4 + $0x4], 32 }
  0x1a   :  { %1346 = vsyncadd [#allocation4 + $0x4], 4294967264 }
  0x1b   :  { %1347 = dma.done.wait [#allocation4 + $0x5], 32 }
  0x1c   :  { %1348 = vsyncadd [#allocation4 + $0x5], 4294967264  ;;  %729 = vmatprep.mubr.f32.mxu0 %v1349_v12  ;;  %806 = vmatprep.mubr.f32.mxu1 %v1349_v12  ;;  %v348_v13 = vld [vmem:[#allocation2 + $0x20] sm:$0xff]  ;;  %v345_v14 = vld [vmem:[#allocation2 + $0x8] sm:$0xff]  ;;  %s1350_s0 = smov 127   ;;  %s1351_s13 = smov 126  }
  0x1d   :  { %v1431_v15 = vld [vmem:[#allocation2 + $0x10] sm:$0xff]  ;;  %362 = vrot.lane.b32.xlu1 %v348_v13, %s1350_s0  ;;  %v1434_v17 = vld [vmem:[#allocation2] sm:$0xff]  ;;  %v1436_v18 = vld [vmem:[#allocation2 + $0x18] sm:$0xff]  ;;  %s1352_s14 = smov 112   ;;  %s1353_s15 = smov 111   ;;  %v1358_v20 = vmov 0  }
  0x1e   :  { %v1225_v16 = vpack.i.bf16 %v1431_v15, %v345_v14  ;;  %v1230_v19 = vpack.i.bf16 %v1436_v18, %v1434_v17  ;;  %s1354_s16 = smov 110   ;;  %s1355_s17 = smov 96   ;;  %1295 = vset.pattern.permute.xlu0 %v1358_v20  ;;  %1296 = vset.pattern.permute.xlu1 %v1358_v20  ;;  %v1445_v21 = vld [vmem:[%s1631_s2 + $0x8] sm:$0xff]  ;;  %v1451_v22 = vld [vmem:[%s1631_s2] sm:$0xff]  ;;  %vm364_vm0 = vcmask 1039360   ;;  %vm397_vm1 = vcmask 1031168  }
  0x1f   :  { %s1356_s18 = smov 95   ;;  %s1357_s19 = smov 94   ;;  %vm430_vm2 = vcmask 916480   ;;  %vm463_vm3 = vcmask 908288   ;;  %vm496_vm4 = vcmask 900096   ;;  %vm529_vm5 = vcmask 785408  }
  0x20   :  { %1226 = vrot.lane.b32.xlu0 %v1225_v16, %s1350_s0  ;;  %vm562_vm6 = vcmask 777216   ;;  %vm595_vm7 = vcmask 769024   ;;  %vm658_vm8 = vcmask 588800  }
  0x21   :  { %1236 = vrot.lane.b32.xlu1 %v1225_v16, %s1351_s13 }
  0x24   :  { %1231 = vrot.lane.b32.xlu0 %v1230_v19, %s1350_s0 }
  0x25   :  { %1246 = vrot.lane.b32.xlu1 %v1230_v19, %s1351_s13 }
  0x28   :  { %1241 = vrot.lane.b32.xlu0 %v1225_v16, %s1352_s14 }
  0x29   :  { %395 = vrot.lane.b32.xlu1 %v348_v13, %s1351_s13 }
  0x2c   :  { %1251 = vrot.lane.b32.xlu0 %v1230_v19, %s1352_s14 }
  0x2d   :  { %1256 = vrot.lane.b32.xlu1 %v1225_v16, %s1353_s15 }
  0x30   :  { %428 = vrot.lane.b32.xlu0 %v348_v13, %s1352_s14 }
  0x31   :  { %1266 = vrot.lane.b32.xlu1 %v1230_v19, %s1353_s15 }
  0x34   :  { %1261 = vrot.lane.b32.xlu0 %v1225_v16, %s1354_s16 }
  0x35   :  { %461 = vrot.lane.b32.xlu1 %v348_v13, %s1353_s15 }
  0x38   :  { %1271 = vrot.lane.b32.xlu0 %v1230_v19, %s1354_s16 }
  0x39   :  { %1276 = vrot.lane.b32.xlu1 %v1225_v16, %s1355_s17 }
  0x3c   :  { %494 = vrot.lane.b32.xlu0 %v348_v13, %s1354_s16 }
  0x3d   :  { %1286 = vrot.lane.b32.xlu1 %v1230_v19, %s1355_s17 }
  0x40   :  { %1281 = vrot.lane.b32.xlu0 %v1225_v16, %s1356_s18 }
  0x41   :  { %527 = vrot.lane.b32.xlu1 %v348_v13, %s1355_s17 }
  0x44   :  { %1291 = vrot.lane.b32.xlu0 %v1230_v19, %s1356_s18 }
  0x45   :  { %587 = vrot.lane.b32.xlu1 %v345_v14, %s1357_s19 }
  0x48   :  { %560 = vrot.lane.b32.xlu0 %v348_v13, %s1356_s18 }
  0x49   :  { %585 = vrot.lane.b32.xlu1 %v1434_v17, %s1357_s19 }
  0x4c   :  { %589 = vrot.lane.b32.xlu0 %v1431_v15, %s1357_s19 }
  0x4d   :  { %593 = vrot.lane.b32.xlu1 %v348_v13, %s1357_s19 }
  0x50   :  { %591 = vrot.lane.b32.xlu0 %v1436_v18, %s1357_s19 }
  0x51   :  { %655 = vperm.xlu1 %1296, %v1445_v21  }
  0x54   :  { %650 = vperm.xlu0 %1295, %v1451_v22  }
  0x8f   :  { %v363_v23 = vpop.permute.xlu1 %362 }
  0x92   :  { %v1227_v24 = vpop.permute.xlu0 %1226 }
  0x93   :  { %v1229_v25 = vunpack.i.h.bf16 %v1227_v24  ;;  %v1228_v26 = vunpack.i.l.bf16 %v1227_v24  ;;  %v1237_v27 = vpop.permute.xlu1 %1236 }
  0x94   :  { %v1239_v34 = vunpack.i.h.bf16 %v1237_v27  ;;  %v1238_v35 = vunpack.i.l.bf16 %v1237_v27 }
  0x95   :  { %v366_v28 = vsel %vm364_vm0, %v1228_v26, %v1229_v25 }
  0x96   :  { %v1232_v29 = vpop.permute.xlu0 %1231  ;;  %v1180_v30 = vpack.c.bf16 %v366_v28, %v345_v14  ;;  %v399_v47 = vsel %vm397_vm1, %v1238_v35, %v1239_v34 }
  0x97   :  { %v1234_v31 = vunpack.i.h.bf16 %v1232_v29  ;;  %v1233_v32 = vunpack.i.l.bf16 %v1232_v29  ;;  %v1247_v33 = vpop.permute.xlu1 %1246 }
  0x98   :  { %1181 = vmatprep.subr.bf16.mxu0 %v1180_v30  ;;  %v1248_v46 = vunpack.i.l.bf16 %v1247_v33  ;;  %v1249_v53 = vunpack.i.h.bf16 %v1247_v33 }
  0x99   :  { %v365_v36 = vsel %vm364_vm0, %v1233_v32, %v1228_v26  ;;  %v368_v37 = vsel %vm364_vm0, %v1234_v31, %v363_v23  ;;  %v367_v41 = vsel %vm364_vm0, %v1229_v25, %v1234_v31 }
  0x9a   :  { %v1242_v38 = vpop.permute.xlu0 %1241  ;;  %v1182_v39 = vpack.c.bf16 %v365_v36, %v1434_v17  ;;  %v1196_v40 = vpack.c.bf16 %v368_v37, %v1436_v18  ;;  %v1198_v44 = vpack.c.bf16 %v367_v41, %v1431_v15  ;;  %v398_v55 = vsel %vm397_vm1, %v1248_v46, %v1238_v35 }
  0x9b   :  { %v1244_v42 = vunpack.i.h.bf16 %v1242_v38  ;;  %v1243_v43 = vunpack.i.l.bf16 %v1242_v38  ;;  %v396_v45 = vpop.permute.xlu1 %395  ;;  %v400_v0 = vsel %vm397_vm1, %v1239_v34, %v1249_v53 }
  0x9c   :  { %1183 = vmatpush1.bf16.msra.mxu0 %v1182_v39  ;;  %1197 = vmatprep.subr.bf16.mxu1 %v1196_v40  ;;  %v401_v60 = vsel %vm397_vm1, %v1249_v53, %v396_v45 }
  0x9d   :  { %1199 = vmatpush1.bf16.msra.mxu1 %v1198_v44  ;;  %v432_v48 = vsel %vm430_vm2, %v1243_v43, %v1244_v42 }
  0x9e   :  { %v1252_v49 = vpop.permute.xlu0 %1251  ;;  %v1184_v50 = vpack.c.bf16 %v432_v48, %v399_v47 }
  0x9f   :  { %v1254_v51 = vunpack.i.h.bf16 %v1252_v49  ;;  %v1253_v52 = vunpack.i.l.bf16 %v1252_v49  ;;  %v1257_v54 = vpop.permute.xlu1 %1256 }
  0xa0   :  { %1185 = vmatprep.subr.bf16.mxu0 %v1184_v50  ;;  %v1259_v1 = vunpack.i.h.bf16 %v1257_v54  ;;  %v1258_v2 = vunpack.i.l.bf16 %v1257_v54 }
  0xa1   :  { %v431_v56 = vsel %vm430_vm2, %v1253_v52, %v1243_v43  ;;  %v433_v59 = vsel %vm430_vm2, %v1244_v42, %v1254_v51 }
  0xa2   :  { %v429_v57 = vpop.permute.xlu0 %428  ;;  %v1186_v58 = vpack.c.bf16 %v431_v56, %v398_v55  ;;  %v1202_v3 = vpack.c.bf16 %v433_v59, %v400_v0  ;;  %v465_v9 = vsel %vm463_vm3, %v1258_v2, %v1259_v1  ;;  %v610_v59 = vld [vmem:[%s1630_s1] sm:$0xff] }
  0xa3   :  { %v434_v61 = vsel %vm430_vm2, %v1254_v51, %v429_v57  ;;  %v1267_v63 = vpop.permute.xlu1 %1266 }
  0xa4   :  { %v1200_v62 = vpack.c.bf16 %v434_v61, %v401_v60  ;;  %1187 = vmatpush1.bf16.msra.mxu0 %v1186_v58  ;;  %v1268_v8 = vunpack.i.l.bf16 %v1267_v63  ;;  %v1269_v16 = vunpack.i.h.bf16 %v1267_v63 }
  0xa6   :  { %v1262_v4 = vpop.permute.xlu0 %1261  ;;  %1201 = vmatprep.subr.bf16.mxu1 %v1200_v62  ;;  %v464_v18 = vsel %vm463_vm3, %v1268_v8, %v1258_v2  ;;  %v466_v29 = vsel %vm463_vm3, %v1259_v1, %v1269_v16  ;;  %v611_v1 = vld [vmem:[%s1630_s1 + $0x8] sm:$0xff] }
  0xa7   :  { %v1264_v5 = vunpack.i.h.bf16 %v1262_v4  ;;  %v1263_v6 = vunpack.i.l.bf16 %v1262_v4  ;;  %1203 = vmatpush1.bf16.msra.mxu1 %v1202_v3  ;;  %v462_v7 = vpop.permute.xlu1 %461 }
  0xa8   :  { %v467_v25 = vsel %vm463_vm3, %v1269_v16, %v462_v7 }
  0xa9   :  { %v498_v10 = vsel %vm496_vm4, %v1263_v6, %v1264_v5 }
  0xaa   :  { %v1272_v11 = vpop.permute.xlu0 %1271  ;;  %v1188_v13 = vpack.c.bf16 %v498_v10, %v465_v9 }
  0xab   :  { %v1274_v14 = vunpack.i.h.bf16 %v1272_v11  ;;  %v1273_v15 = vunpack.i.l.bf16 %v1272_v11  ;;  %v1277_v17 = vpop.permute.xlu1 %1276 }
  0xac   :  { %1189 = vmatprep.subr.bf16.mxu0 %v1188_v13  ;;  %v1279_v30 = vunpack.i.h.bf16 %v1277_v17  ;;  %v1278_v31 = vunpack.i.l.bf16 %v1277_v17 }
  0xad   :  { %v497_v19 = vsel %vm496_vm4, %v1273_v15, %v1263_v6  ;;  %v499_v24 = vsel %vm496_vm4, %v1264_v5, %v1274_v14 }
  0xae   :  { %v495_v20 = vpop.permute.xlu0 %494  ;;  %v1190_v23 = vpack.c.bf16 %v497_v19, %v464_v18  ;;  %v1206_v32 = vpack.c.bf16 %v499_v24, %v466_v29  ;;  %v531_v38 = vsel %vm529_vm5, %v1278_v31, %v1279_v30 }
  0xaf   :  { %v500_v26 = vsel %vm496_vm4, %v1274_v14, %v495_v20  ;;  %v1287_v28 = vpop.permute.xlu1 %1286 }
  0xb0   :  { %v1204_v27 = vpack.c.bf16 %v500_v26, %v467_v25  ;;  %1191 = vmatpush1.bf16.msra.mxu0 %v1190_v23  ;;  %v1288_v37 = vunpack.i.l.bf16 %v1287_v28  ;;  %v1289_v44 = vunpack.i.h.bf16 %v1287_v28 }
  0xb2   :  { %v1282_v33 = vpop.permute.xlu0 %1281  ;;  %1205 = vmatprep.subr.bf16.mxu1 %v1204_v27  ;;  %v530_v46 = vsel %vm529_vm5, %v1288_v37, %v1278_v31  ;;  %v532_v55 = vsel %vm529_vm5, %v1279_v30, %v1289_v44 }
  0xb3   :  { %v1284_v34 = vunpack.i.h.bf16 %v1282_v33  ;;  %v1283_v35 = vunpack.i.l.bf16 %v1282_v33  ;;  %1207 = vmatpush1.bf16.msra.mxu1 %v1206_v32  ;;  %v528_v36 = vpop.permute.xlu1 %527 }
  0xb4   :  { %v533_v51 = vsel %vm529_vm5, %v1289_v44, %v528_v36 }
  0xb5   :  { %v564_v39 = vsel %vm562_vm6, %v1283_v35, %v1284_v34 }
  0xb6   :  { %v1292_v40 = vpop.permute.xlu0 %1291  ;;  %v1192_v41 = vpack.c.bf16 %v564_v39, %v531_v38 }
  0xb7   :  { %v1294_v42 = vunpack.i.h.bf16 %v1292_v40  ;;  %v1293_v43 = vunpack.i.l.bf16 %v1292_v40  ;;  %v588_v45 = vpop.permute.xlu1 %587 }
  0xb8   :  { %1193 = vmatprep.subr.bf16.mxu0 %v1192_v41 }
  0xb9   :  { %v563_v47 = vsel %vm562_vm6, %v1293_v43, %v1283_v35  ;;  %v565_v50 = vsel %vm562_vm6, %v1284_v34, %v1294_v42 }
  0xba   :  { %v561_v48 = vpop.permute.xlu0 %560  ;;  %v1194_v49 = vpack.c.bf16 %v563_v47, %v530_v46  ;;  %v1210_v56 = vpack.c.bf16 %v565_v50, %v532_v55 }
  0xbb   :  { %v566_v52 = vsel %vm562_vm6, %v1294_v42, %v561_v48  ;;  %v586_v54 = vpop.permute.xlu1 %585 }
  0xbc   :  { %v1208_v53 = vpack.c.bf16 %v566_v52, %v533_v51  ;;  %1195 = vmatpush1.bf16.msra.mxu0 %v1194_v49  ;;  %v596_v60 = vsel %vm595_vm7, %v586_v54, %v588_v45  ;;  %v909_v54 = vlaneseq }
  0xbe   :  { %v590_v57 = vpop.permute.xlu0 %589  ;;  %1209 = vmatprep.subr.bf16.mxu1 %v1208_v53 }
  0xbf   :  { %1211 = vmatpush1.bf16.msra.mxu1 %v1210_v56  ;;  %v597_v58 = vsel %vm595_vm7, %v588_v45, %v590_v57  ;;  %v594_v61 = vpop.permute.xlu1 %593 }
  0xc0   :  { %681 = vmatprep.subr.mxu0 %v597_v58 }
  0xc1   :  { %682 = vmatpush1.msra.mxu0 %v596_v60 }
  0xc2   :  { %v592_v62 = vpop.permute.xlu0 %591  ;;  %1170 = vmatmul.mubr.msk.f32.vlgmr.msra.gmra.mrb[0].mxu0 %vm658_vm8, %v610_v59 }
  0xc3   :  { %v599_v63 = vsel %vm595_vm7, %v592_v62, %v594_v61  ;;  %735 = vmatprep.mubr.f32.mxu0 %v1349_v12  ;;  %v598_v0 = vsel %vm595_vm7, %v590_v57, %v592_v62 }
  0xc4   :  { %758 = vmatprep.subr.mxu1 %v599_v63 }
  0xc5   :  { %759 = vmatpush1.msra.mxu1 %v598_v0 }
  0xc6   :  { %1171 = vmatmul.mubr.msk.f32.gmra.mrb[2].mxu0 %vm658_vm8, %v611_v1  ;;  %1172 = vmatmul.mubr.msk.f32.vlgmr.msra.gmra.mrb[0].mxu1 %vm658_vm8, %v610_v59 }
  0xc7   :  { %812 = vmatprep.mubr.f32.mxu1 %v1349_v12 }
  0xca   :  { %1173 = vmatmul.mubr.msk.f32.gmra.mrb[2].mxu1 %vm658_vm8, %v611_v1 }
  0xd0   :  { %v656_v7 = vpop.permute.xlu1 %655 }
  0xd3   :  { %v651_v2 = vpop.permute.xlu0 %650 }
 0x195   :  { %v731_v3 = vpop.f32.mrb[0].mxu0 }
 0x196   :  { %v1498_v4 = vadd.f32 %v731_v3, %v651_v2  ;;  %v733_v5 = vpop.f32.mrb[1].mxu0  ;;  %v910_v3 = vshrl.u32 %v909_v54, 7 }
 0x197   :  { %v1500_v6 = vadd.f32 %v733_v5, %v651_v2 }
 0x198   :  { %v819_v8 = vmin.f32 %v1498_v4, 20.0  ;;  %vm859_vm9 = vcmp.gt.f32.partialorder %v1498_v4, 20.0 }
 0x199   :  { %v820_v9 = vmin.f32 %v1500_v6, 20.0  ;;  %v737_v10 = vpop.f32.mrb[2].mxu0  ;;  %v808_v11 = vpop.f32.mrb[0].mxu1  ;;  %vm860_vm10 = vcmp.gt.f32.partialorder %v1500_v6, 20.0 }
 0x19a   :  { %v827_v13 = vmul.f32 1.442695, %v819_v8  ;;  %v1504_v14 = vadd.f32 %v737_v10, %v656_v7  ;;  %v1506_v12 = vadd.f32 %v808_v11, %v651_v2  ;;  %v739_v15 = vpop.f32.mrb[3].mxu0  ;;  %v810_v16 = vpop.f32.mrb[1].mxu1  ;;  %v911_v10 = vsub.s32 0, %v910_v3 }
 0x19b   :  { %v829_v17 = vmul.f32 1.442695, %v820_v9  ;;  %v1508_v18 = vadd.f32 %v739_v15, %v656_v7  ;;  %v1510_v19 = vadd.f32 %v810_v16, %v651_v2  ;;  %v907_v11 = vld [vmem:[%s1632_s3] sm:$0xf]  ;;  %v919_v15 = vsub.s32 2, %v910_v3  ;;  %s1360_s3 = smov 1  }
 0x19c   :  { %1301 = vpow2.f32 %v827_v13  ;;  %v823_v20 = vmin.f32 %v1504_v14, 20.0  ;;  %v821_v23 = vmin.f32 %v1506_v12, 20.0  ;;  %v915_v13 = vsub.s32 1, %v910_v3 }
 0x19d   :  { %1303 = vpow2.f32 %v829_v17  ;;  %v824_v24 = vmin.f32 %v1508_v18, 20.0  ;;  %v814_v25 = vpop.f32.mrb[2].mxu1  ;;  %v822_v28 = vmin.f32 %v1510_v19, 20.0  ;;  %v923_v16 = vsub.s32 3, %v910_v3 }
 0x19e   :  { %v835_v26 = vmul.f32 1.442695, %v823_v20  ;;  %v831_v27 = vmul.f32 1.442695, %v821_v23  ;;  %v1516_v29 = vadd.f32 %v814_v25, %v656_v7  ;;  %v816_v30 = vpop.f32.mrb[3].mxu1  ;;  %v912_v25 = vrot.slane %v907_v11, %v911_v10 }
 0x19f   :  { %v837_v31 = vmul.f32 1.442695, %v824_v24  ;;  %v1518_v32 = vadd.f32 %v816_v30, %v656_v7  ;;  %v833_v33 = vmul.f32 1.442695, %v822_v28  ;;  %v920_v28 = vrot.slane %v907_v11, %v919_v15 }
 0x1a0   :  { %1305 = vpow2.f32 %v835_v26  ;;  %v825_v34 = vmin.f32 %v1516_v29, 20.0  ;;  %v924_v30 = vrot.slane %v907_v11, %v923_v16  ;;  %vm863_vm11 = vcmp.gt.f32.partialorder %v1504_v14, 20.0 }
 0x1a1   :  { %1307 = vpow2.f32 %v831_v27  ;;  %v826_v35 = vmin.f32 %v1518_v32, 20.0  ;;  %v916_v27 = vrot.slane %v907_v11, %v915_v13  ;;  %vm861_vm12 = vcmp.gt.f32.partialorder %v1506_v12, 20.0 }
 0x1a2   :  { %1309 = vpow2.f32 %v837_v31  ;;  %v839_v36 = vmul.f32 1.442695, %v825_v34  ;;  %vm864_vm13 = vcmp.gt.f32.partialorder %v1508_v18, 20.0  ;;  %vm862_vm14 = vcmp.gt.f32.partialorder %v1510_v19, 20.0 }
 0x1a3   :  { %1311 = vpow2.f32 %v833_v33  ;;  %v841_v37 = vmul.f32 1.442695, %v826_v35  ;;  %vm865_vm15 = vcmp.gt.f32.partialorder %v1516_v29, 20.0  ;;  %vm866_vm0 = vcmp.gt.f32.partialorder %v1518_v32, 20.0 }
 0x1a4   :  { %1313 = vpow2.f32 %v839_v36 }
 0x1a5   :  { %1315 = vpow2.f32 %v841_v37 }
 0x1a6   :  { %v1302_v38 = vpop.eup %1301 }
 0x1a7   :  { %v1304_v39 = vpop.eup %1303  ;;  %v843_v40 = vadd.f32 2.0, %v1302_v38 }
 0x1a8   :  { %v844_v41 = vadd.f32 2.0, %v1304_v39 }
 0x1a9   :  { %v851_v42 = vmul.f32 %v1302_v38, %v843_v40 }
 0x1aa   :  { %v1306_v43 = vpop.eup %1305  ;;  %v852_v44 = vmul.f32 %v1304_v39, %v844_v41 }
 0x1ab   :  { %v1308_v45 = vpop.eup %1307  ;;  %v867_v46 = vadd.f32 2.0, %v851_v42  ;;  %v847_v47 = vadd.f32 2.0, %v1306_v43 }
 0x1ac   :  { %v1310_v48 = vpop.eup %1309  ;;  %v868_v49 = vadd.f32 2.0, %v852_v44  ;;  %v845_v50 = vadd.f32 2.0, %v1308_v45 }
 0x1ad   :  { %v1312_v51 = vpop.eup %1311  ;;  %1317 = vrcp.f32 %v867_v46  ;;  %v855_v52 = vmul.f32 %v1306_v43, %v847_v47  ;;  %v848_v53 = vadd.f32 2.0, %v1310_v48 }
 0x1ae   :  { %v1314_v55 = vpop.eup %1313  ;;  %1319 = vrcp.f32 %v868_v49  ;;  %v853_v56 = vmul.f32 %v1308_v45, %v845_v50  ;;  %v846_v57 = vadd.f32 2.0, %v1312_v51 }
 0x1af   :  { %v1316_v58 = vpop.eup %1315  ;;  %v871_v59 = vadd.f32 2.0, %v855_v52  ;;  %v856_v60 = vmul.f32 %v1310_v48, %v848_v53  ;;  %v849_v61 = vadd.f32 2.0, %v1314_v55 }
 0x1b0   :  { %v869_v62 = vadd.f32 2.0, %v853_v56  ;;  %v854_v63 = vmul.f32 %v1312_v51, %v846_v57  ;;  %v850_v0 = vadd.f32 2.0, %v1316_v58 }
 0x1b1   :  { %1321 = vrcp.f32 %v871_v59  ;;  %v872_v1 = vadd.f32 2.0, %v856_v60  ;;  %v857_v2 = vmul.f32 %v1314_v55, %v849_v61 }
 0x1b2   :  { %1323 = vrcp.f32 %v869_v62  ;;  %v870_v5 = vadd.f32 2.0, %v854_v63  ;;  %v858_v7 = vmul.f32 %v1316_v58, %v850_v0 }
 0x1b3   :  { %1325 = vrcp.f32 %v872_v1  ;;  %v873_v8 = vadd.f32 2.0, %v857_v2 }
 0x1b4   :  { %1327 = vrcp.f32 %v870_v5  ;;  %v874_v9 = vadd.f32 2.0, %v858_v7 }
 0x1b5   :  { %1329 = vrcp.f32 %v873_v8 }
 0x1b6   :  { %1331 = vrcp.f32 %v874_v9 }
 0x1b7   :  { %v1318_v17 = vpop.eup %1317 }
 0x1b8   :  { %v1320_v20 = vpop.eup %1319  ;;  %v876_v23 = vmul.f32 %v1318_v17, %v851_v42 }
 0x1b9   :  { %v878_v24 = vmul.f32 %v1320_v20, %v852_v44 }
 0x1ba   :  { %v891_v26 = vmul.f32 %v876_v23, %v1498_v4  ;;  %v1359_v23 = vmov 1  }
 0x1bb   :  { %v1322_v31 = vpop.eup %1321  ;;  %v892_v33 = vmul.f32 %v878_v24, %v1500_v6  ;;  %1297 = vset.pattern.permute.xlu1 %v1359_v23  ;;  %1298 = vset.pattern.permute.xlu0 %v1359_v23 }
 0x1bc   :  { %v1324_v34 = vpop.eup %1323  ;;  %v1531_v35 = vsel %vm859_vm9, %v1498_v4, %v891_v26  ;;  %v884_v36 = vmul.f32 %v1322_v31, %v855_v52 }
 0x1bd   :  { %v1326_v37 = vpop.eup %1325  ;;  %v1536_v38 = vsel %vm860_vm10, %v1500_v6, %v892_v33  ;;  %v880_v39 = vmul.f32 %v1324_v34, %v853_v56  ;;  %v929_v40 = vmul.f32 %v912_v25, %v1531_v35 }
 0x1be   :  { %v1328_v41 = vpop.eup %1327  ;;  %v895_v42 = vmul.f32 %v884_v36, %v1504_v14  ;;  %v886_v43 = vmul.f32 %v1326_v37, %v856_v60  ;;  %v930_v4 = vmul.f32 %v916_v27, %v1536_v38 }
 0x1bf   :  { %v1330_v44 = vpop.eup %1329  ;;  %v893_v45 = vmul.f32 %v880_v39, %v1506_v12  ;;  %v882_v46 = vmul.f32 %v1328_v41, %v854_v63  ;;  %v949_v6 = vmul.f32 %v929_v40, %v1531_v35 }
 0x1c0   :  { %v1332_v47 = vpop.eup %1331  ;;  %v1549_v48 = vsel %vm863_vm11, %v1504_v14, %v895_v42  ;;  %v896_v49 = vmul.f32 %v886_v43, %v1508_v18  ;;  %v888_v50 = vmul.f32 %v1330_v44, %v857_v2  ;;  %v937_v51 = vadd.f32 %v930_v4, %v929_v40 }
 0x1c1   :  { %v894_v52 = vmul.f32 %v882_v46, %v1510_v19  ;;  %v890_v53 = vmul.f32 %v1332_v47, %v858_v7  ;;  %v1556_v54 = vsel %vm861_vm12, %v1506_v12, %v893_v45  ;;  %v933_v55 = vmul.f32 %v912_v25, %v1549_v48 }
 0x1c2   :  { %v1562_v56 = vsel %vm864_vm13, %v1508_v18, %v896_v49  ;;  %v897_v14 = vmul.f32 %v888_v50, %v1516_v29  ;;  %v931_v57 = vmul.f32 %v920_v28, %v1556_v54  ;;  %v950_v58 = vmul.f32 %v930_v4, %v1536_v38 }
 0x1c3   :  { %v898_v59 = vmul.f32 %v890_v53, %v1518_v32  ;;  %v1571_v12 = vsel %vm862_vm14, %v1510_v19, %v894_v52  ;;  %v934_v60 = vmul.f32 %v916_v27, %v1562_v56  ;;  %v953_v61 = vmul.f32 %v933_v55, %v1549_v48 }
 0x1c4   :  { %v932_v18 = vmul.f32 %v924_v30, %v1571_v12  ;;  %v938_v62 = vadd.f32 %v937_v51, %v931_v57  ;;  %v1579_v63 = vsel %vm865_vm15, %v1516_v29, %v897_v14  ;;  %v951_v0 = vmul.f32 %v931_v57, %v1556_v54 }
 0x1c5   :  { %v1585_v1 = vsel %vm866_vm0, %v1518_v32, %v898_v59  ;;  %v935_v19 = vmul.f32 %v920_v28, %v1579_v63  ;;  %v942_v2 = vadd.f32 %v934_v60, %v933_v55  ;;  %v954_v3 = vmul.f32 %v934_v60, %v1562_v56 }
 0x1c6   :  { %v939_v5 = vadd.f32 %v938_v62, %v932_v18  ;;  %v936_v7 = vmul.f32 %v924_v30, %v1585_v1  ;;  %v957_v8 = vadd.f32 %v950_v58, %v949_v6  ;;  %v952_v32 = vmul.f32 %v932_v18, %v1571_v12 }
 0x1c7   :  { %v943_v9 = vadd.f32 %v942_v2, %v935_v19  ;;  %v955_v29 = vmul.f32 %v935_v19, %v1579_v63  ;;  %v962_v10 = vadd.f32 %v954_v3, %v953_v61  ;;  %v1361_v6 = vmov 2  }
 0x1c8   :  { %940 = vadd.xlane.f32.xlu1 %v939_v5  ;;  %v956_v11 = vmul.f32 %v936_v7, %v1585_v1  ;;  %v958_v16 = vadd.f32 %v957_v8, %v951_v0 }
 0x1c9   :  { %v944_v13 = vadd.f32 %v943_v9, %v936_v7  ;;  %v963_v15 = vadd.f32 %v962_v10, %v955_v29 }
 0x1ca   :  { %v959_v20 = vadd.f32 %v958_v16, %v952_v32 }
 0x1cb   :  { %945 = vadd.xlane.f32.xlu0 %v944_v13  ;;  %v964_v17 = vadd.f32 %v963_v15, %v956_v11 }
 0x1cd   :  { %965 = vadd.xlane.f32.xlu1 %v964_v17 }
 0x1cf   :  { %960 = vadd.xlane.f32.xlu0 %v959_v20 }
 0x255   :  { %v941_v24 = vpop.xlane.xlu1 %940 }
 0x256   :  { %v947_v26 = vmul.f32 0.0025510204, %v941_v24 }
 0x258   :  { %v946_v25 = vpop.xlane.xlu0 %945  ;;  %v969_v34 = vmul.f32 %v947_v26, %v947_v26 }
 0x259   :  { %v948_v27 = vmul.f32 0.0025510204, %v946_v25 }
 0x25a   :  { %v966_v28 = vpop.xlane.xlu1 %965 }
 0x25b   :  { %v970_v30 = vmul.f32 %v948_v27, %v948_v27  ;;  %v968_v31 = vmul.f32 0.0025510204, %v966_v28 }
 0x25c   :  { %v961_v33 = vpop.xlane.xlu0 %960 }
 0x25d   :  { %v972_v36 = vsub.f32 %v968_v31, %v970_v30  ;;  %v967_v37 = vmul.f32 0.0025510204, %v961_v33 }
 0x25f   :  { %v974_v39 = vadd.f32 1e-05, %v972_v36  ;;  %v971_v40 = vsub.f32 %v967_v37, %v969_v34 }
 0x261   :  { %1333 = vrsqrt.f32 %v974_v39  ;;  %v973_v41 = vadd.f32 1e-05, %v971_v40 }
 0x263   :  { %1335 = vrsqrt.f32 %v973_v41 }
 0x26b   :  { %v1334_v42 = vpop.eup %1333 }
 0x26c   :  { %v978_v43 = vmul.f32 %v1334_v42, %v1445_v21 }
 0x26d   :  { %v1336_v4 = vpop.eup %1335 }
 0x26e   :  { %v980_v44 = vmul.f32 %v978_v43, %v948_v27  ;;  %v977_v45 = vmul.f32 %v1336_v4, %v1451_v22 }
 0x270   :  { %985 = vrot.lane.b32.xlu1 %v980_v44, %s1360_s3  ;;  %v979_v46 = vmul.f32 %v977_v45, %v947_v26 }
 0x272   :  { %983 = vrot.lane.b32.xlu0 %v979_v46, %s1360_s3 }
 0x274   :  { %993 = vperm.xlu1 %1297, %v977_v45  }
 0x276   :  { %998 = vperm.xlu0 %1298, %v978_v43  }
 0x278   :  { %1299 = vset.pattern.permute.xlu1 %v1361_v6 }
 0x27a   :  { %1300 = vset.pattern.permute.xlu0 %v1361_v6 }
 0x2e2   :  { %v986_v50 = vpop.permute.xlu1 %985 }
 0x2e3   :  { %v990_v51 = vsub.f32 %v1445_v21, %v986_v50 }
 0x2e4   :  { %v984_v47 = vpop.permute.xlu0 %983 }
 0x2e5   :  { %v989_v49 = vsub.f32 %v1451_v22, %v984_v47 }
 0x2e7   :  { %1011 = vperm.xlu1 %1299, %v989_v49  }
 0x2eb   :  { %1016 = vperm.xlu1 %1299, %v990_v51  }
 0x2f3   :  { %v994_v52 = vpop.permute.xlu1 %993 }
 0x2f4   :  { %v1001_v53 = vmul.f32 %v994_v52, %v1531_v35  ;;  %v1002_v55 = vmul.f32 %v994_v52, %v1536_v38  ;;  %v1003_v14 = vmul.f32 %v994_v52, %v1556_v54  ;;  %v1004_v57 = vmul.f32 %v994_v52, %v1571_v12 }
 0x2f5   :  { %v999_v58 = vpop.permute.xlu0 %998 }
 0x2f6   :  { %v1005_v62 = vmul.f32 %v999_v58, %v1549_v48  ;;  %v1006_v21 = vmul.f32 %v999_v58, %v1562_v56  ;;  %v1007_v0 = vmul.f32 %v999_v58, %v1579_v63  ;;  %v1008_v35 = vmul.f32 %v999_v58, %v1585_v1 }
 0x366   :  { %v1012_v59 = vpop.permute.xlu1 %1011 }
 0x367   :  { %v1019_v60 = vadd.f32 %v1012_v59, %v1001_v53  ;;  %v1020_v61 = vadd.f32 %v1012_v59, %v1002_v55  ;;  %v1021_v18 = vadd.f32 %v1012_v59, %v1003_v14  ;;  %v1022_v22 = vadd.f32 %v1012_v59, %v1004_v57 }
 0x369   :  { %1027 = vst [vmem:[%s1633_s4] sm:$0xff] %v1019_v60  ;;  %1028 = vst [vmem:[%s1633_s4 + $0x8] sm:$0xff] %v1020_v61 }
 0x36a   :  { %1029 = vst [vmem:[%s1633_s4 + $0x10] sm:$0xff] %v1021_v18  ;;  %1030 = vst [vmem:[%s1633_s4 + $0x18] sm:$0xff] %v1022_v22  ;;  %v1017_v38 = vpop.permute.xlu1 %1016 }
 0x36b   :  { %v1023_v48 = vadd.f32 %v1017_v38, %v1005_v62  ;;  %v1024_v54 = vadd.f32 %v1017_v38, %v1006_v21  ;;  %v1025_v56 = vadd.f32 %v1017_v38, %v1007_v0  ;;  %v1026_v12 = vadd.f32 %v1017_v38, %v1008_v35 }
 0x36d   :  { %1031 = vst [vmem:[%s1633_s4 + $0x20] sm:$0xff] %v1023_v48  ;;  %1032 = vst [vmem:[%s1633_s4 + $0x28] sm:$0xff] %v1024_v54 }
 0x36e   :  { %1033 = vst [vmem:[%s1633_s4 + $0x30] sm:$0xff] %v1025_v56  ;;  %1034 = vst [vmem:[%s1633_s4 + $0x38] sm:$0xff] %v1026_v12 }
 0x36f   :  { %1039 = vsyncmov [#allocation4] }
 0x372   :  { %s1040_s17 = vpop.sfrf %1039 }
 0x373   :  { %p1174_p0 = scmp.ne.s32.totalorder %s1040_s17, 0 }
 0x375   :  { %1044 = shalt.err (%p1174_p0)  }
 0x376   :  { %1046 = vsyncmov [#allocation4 + $0x1] }
 0x379   :  { %s1047_s18 = vpop.sfrf %1046 }
 0x37a   :  { %p1175_p1 = scmp.ne.s32.totalorder %s1047_s18, 0 }
 0x37c   :  { %1051 = shalt.err (%p1175_p1)  }
 0x37d   :  { %1053 = vsyncmov [#allocation4 + $0x2] }
 0x380   :  { %s1054_s19 = vpop.sfrf %1053 }
 0x381   :  { %p1176_p2 = scmp.ne.s32.totalorder %s1054_s19, 0 }
 0x383   :  { %1058 = shalt.err (%p1176_p2)  }
 0x384   :  { %1060 = vsyncmov [#allocation4 + $0x3] }
 0x387   :  { %s1061_s20 = vpop.sfrf %1060 }
 0x388   :  { %p1177_p3 = scmp.ne.s32.totalorder %s1061_s20, 0 }
 0x38a   :  { %1065 = shalt.err (%p1177_p3)  }
 0x38b   :  { %1067 = vsyncmov [#allocation4 + $0x4] }
 0x38e   :  { %s1068_s21 = vpop.sfrf %1067 }
 0x38f   :  { %p1178_p4 = scmp.ne.s32.totalorder %s1068_s21, 0 }
 0x391   :  { %1072 = shalt.err (%p1178_p4)  }
 0x392   :  { %1074 = vsyncmov [#allocation4 + $0x5] }
 0x395   :  { %s1075_s4 = vpop.sfrf %1074 }
 0x396   :  { %p1179_p5 = scmp.ne.s32.totalorder %s1075_s4, 0 }
 0x398   :  { %1079 = shalt.err (%p1179_p5)  }

</bundles_post_ra>
